<compile_context>
chip_gen: v7x
topology: tpu7x:2x2x1
jax: 0.10.0
libtpu: 0.0.40
codegen_flags: <defaults>
</compile_context>

<pallas_src>
import jax
import jax.numpy as jnp
import numpy as np
from jax.experimental import pallas as pl
from jax.experimental.pallas import tpu as pltpu

# ----------------------------- config ---------------------------------------
S = 8          # sequence length
B = 2          # batch
D = 32         # dim_hidden
H = 4          # num_heads
HD = D // H    # head dim
FF = 64        # dim_feedforward
EPS = 1e-5     # LayerNorm eps (PyTorch default)
N = B * S      # flattened rows (batch-major: row = b*S + s)


# ----------------------------- kernel ---------------------------------------
def encoder_layer_kernel(x_ref, pos_ref,
                         wqT_ref, bq_ref, wkT_ref, bk_ref, wvT_ref, bv_ref,
                         woT_ref, bo_ref,
                         g1_ref, be1_ref,
                         w1T_ref, bl1_ref, w2T_ref, bl2_ref,
                         g2_ref, be2_ref,
                         o_ref):
    x = x_ref[...]                      # (N, D), rows are (b, s) batch-major
    qk_in = x + pos_ref[...]            # positional encoding feeds only Q/K

    # ---- fused Q/K/V projections over all B*S rows ----
    # (weights already transposed in the wrapper; attention scale folded
    #  into wqT/bq, so no per-score multiply below)
    q = jnp.dot(qk_in, wqT_ref[...], preferred_element_type=jnp.float32) + bq_ref[...]
    k = jnp.dot(qk_in, wkT_ref[...], preferred_element_type=jnp.float32) + bk_ref[...]
    v = jnp.dot(x, wvT_ref[...], preferred_element_type=jnp.float32) + bv_ref[...]

    # (N, D) -> (B*H, S, HD) via leading-dim reshapes + minor (last-two) swaps.
    def split_heads(t):
        t = t.reshape(B, S, D)
        t = jnp.swapaxes(t, 1, 2)        # (B, D, S)
        t = t.reshape(B * H, HD, S)      # split D = H*HD into the lead axis
        return jnp.swapaxes(t, 1, 2)     # (B*H, S, HD)

    qh = split_heads(q)
    kh = split_heads(k)
    vh = split_heads(v)

    # ---- batched attention over all (batch, head) pairs at once ----
    s = jnp.einsum("nsd,ntd->nst", qh, kh,
                   preferred_element_type=jnp.float32)       # (B*H, S, S)
    s = s - jnp.max(s, axis=-1, keepdims=True)
    p = jnp.exp(s)
    p = p * pl.reciprocal(jnp.sum(p, axis=-1, keepdims=True), approx=True)
    ctx = jnp.einsum("nst,ntd->nsd", p, vh,
                     preferred_element_type=jnp.float32)     # (B*H, S, HD)

    # (B*H, S, HD) -> (N, D)  (inverse of split_heads)
    ctx = jnp.swapaxes(ctx, 1, 2).reshape(B, D, S)           # (B, D, S)
    ctx = jnp.swapaxes(ctx, 1, 2).reshape(N, D)              # (N, D)

    attn = jnp.dot(ctx, woT_ref[...], preferred_element_type=jnp.float32) + bo_ref[...]

    # ---- residual + LayerNorm1 (dropout1 = identity in eval) ----
    y = x + attn
    mu = jnp.mean(y, axis=-1, keepdims=True)
    var = jnp.mean((y - mu) ** 2, axis=-1, keepdims=True)
    y = (y - mu) * jax.lax.rsqrt(var + EPS) * g1_ref[...] + be1_ref[...]

    # ---- feed-forward: linear2(relu(linear1(y))) ----
    h1 = jnp.maximum(
        jnp.dot(y, w1T_ref[...], preferred_element_type=jnp.float32) + bl1_ref[...],
        0.0)
    ffn = jnp.dot(h1, w2T_ref[...], preferred_element_type=jnp.float32) + bl2_ref[...]

    # ---- residual + LayerNorm2 (dropout2 = identity in eval) ----
    z = y + ffn
    mu2 = jnp.mean(z, axis=-1, keepdims=True)
    var2 = jnp.mean((z - mu2) ** 2, axis=-1, keepdims=True)
    z = (z - mu2) * jax.lax.rsqrt(var2 + EPS) * g2_ref[...] + be2_ref[...]

    # ---- single dense output store ----
    o_ref[...] = z.astype(o_ref.dtype)


# ----------------------------- wrapper ---------------------------------------
@jax.jit
def transformer_encoder_layer(x, pos, params):
    # Layout plumbing outside the kernel: (S, B, D) -> (B*S, D), D on lanes.
    xf = jnp.transpose(x, (1, 0, 2)).reshape(N, D)
    pf = jnp.transpose(pos, (1, 0, 2)).reshape(N, D)

    scale = jnp.float32(1.0 / np.sqrt(HD))
    args = (
        xf, pf,
        (params["wq"] * scale).T, params["bq"] * scale,   # scale folded into Q
        params["wk"].T, params["bk"],
        params["wv"].T, params["bv"],
        params["wo"].T, params["bo"],
        params["g1"], params["be1"],
        params["w1"].T, params["bl1"],
        params["w2"].T, params["bl2"],
        params["g2"], params["be2"],
    )
    vmem = pl.BlockSpec(memory_space=pltpu.MemorySpace.VMEM)
    # Grid-less single-shot kernel: everything fits comfortably in VMEM at
    # these sizes on v5e/v6e/v7x.
    # TODO(synk): if B/S scale up, add a batch grid with
    # dimension_semantics=("parallel",) so both v7x TensorCores are used.
    out = pl.pallas_call(
        encoder_layer_kernel,
        out_shape=jax.ShapeDtypeStruct((N, D), jnp.float32),
        in_specs=[vmem] * len(args),
        out_specs=vmem,
    )(*args)
    return jnp.transpose(out.reshape(B, S, D), (1, 0, 2))


# ----------------------------- pure-JAX reference ----------------------------
def ref_forward(x, pos, p):
    qk = x + pos
    q = jnp.einsum("sbd,ed->sbe", qk, p["wq"]) + p["bq"][0]
    k = jnp.einsum("sbd,ed->sbe", qk, p["wk"]) + p["bk"][0]
    v = jnp.einsum("sbd,ed->sbe", x, p["wv"]) + p["bv"][0]
    qh = q.reshape(S, B, H, HD)
    kh = k.reshape(S, B, H, HD)
    vh = v.reshape(S, B, H, HD)
    scores = jnp.einsum("sbhd,tbhd->bhst", qh, kh) / np.sqrt(HD)
    probs = jax.nn.softmax(scores, axis=-1)
    attn = jnp.einsum("bhst,tbhd->sbhd", probs, vh).reshape(S, B, D)
    attn = jnp.einsum("sbd,ed->sbe", attn, p["wo"]) + p["bo"][0]

    def ln(t, g, b):
        mu = jnp.mean(t, axis=-1, keepdims=True)
        var = jnp.mean((t - mu) ** 2, axis=-1, keepdims=True)
        return (t - mu) * jax.lax.rsqrt(var + EPS) * g[0] + b[0]

    y = ln(x + attn, p["g1"], p["be1"])
    hdn = jax.nn.relu(jnp.einsum("sbd,fd->sbf", y, p["w1"]) + p["bl1"][0])
    ffn = jnp.einsum("sbf,df->sbd", hdn, p["w2"]) + p["bl2"][0]
    return ln(y + ffn, p["g2"], p["be2"])


# ----------------------------- main ------------------------------------------
if __name__ == "__main__":
    key = jax.random.PRNGKey(0)
    ks = jax.random.split(key, 16)

    def w(k, shape, scale=0.05):
        return (scale * jax.random.normal(k, shape)).astype(jnp.float32)

    params = {
        # MultiheadAttention in_proj split into q/k/v, plus out_proj
        "wq": w(ks[0], (D, D)), "bq": w(ks[1], (1, D)),
        "wk": w(ks[2], (D, D)), "bk": w(ks[3], (1, D)),
        "wv": w(ks[4], (D, D)), "bv": w(ks[5], (1, D)),
        "wo": w(ks[6], (D, D)), "bo": w(ks[7], (1, D)),
        # LayerNorm1 / LayerNorm2
        "g1": jnp.ones((1, D), jnp.float32), "be1": jnp.zeros((1, D), jnp.float32),
        "g2": jnp.ones((1, D), jnp.float32), "be2": jnp.zeros((1, D), jnp.float32),
        # FFN
        "w1": w(ks[8], (FF, D)), "bl1": w(ks[9], (1, FF)),
        "w2": w(ks[10], (D, FF)), "bl2": w(ks[11], (1, D)),
    }

    x = jax.random.normal(ks[12], (S, B, D), dtype=jnp.float32)
    pos = 0.1 * jax.random.normal(ks[13], (S, B, D), dtype=jnp.float32)

    out = transformer_encoder_layer(x, pos, params)
    out = jax.block_until_ready(out)

    ref = ref_forward(x, pos, params)
    # Slightly relaxed tolerance: softmax denominator uses the EUP approximate
    # reciprocal (pl.reciprocal(..., approx=True)).
    np.testing.assert_allclose(np.asarray(out), np.asarray(ref),
                               rtol=2e-3, atol=2e-3)

    print("KERNEL_OK")
</pallas_src>

<mosaic_0001>
module attributes {stable_mosaic.version = 11 : i64} {
  func.func @encoder_layer_kernel(%arg0: memref<16x32xf32, #tpu.memory_space<vmem>>, %arg1: memref<16x32xf32, #tpu.memory_space<vmem>>, %arg2: memref<32x32xf32, #tpu.memory_space<vmem>>, %arg3: memref<1x32xf32, #tpu.memory_space<vmem>>, %arg4: memref<32x32xf32, #tpu.memory_space<vmem>>, %arg5: memref<1x32xf32, #tpu.memory_space<vmem>>, %arg6: memref<32x32xf32, #tpu.memory_space<vmem>>, %arg7: memref<1x32xf32, #tpu.memory_space<vmem>>, %arg8: memref<32x32xf32, #tpu.memory_space<vmem>>, %arg9: memref<1x32xf32, #tpu.memory_space<vmem>>, %arg10: memref<1x32xf32, #tpu.memory_space<vmem>>, %arg11: memref<1x32xf32, #tpu.memory_space<vmem>>, %arg12: memref<32x64xf32, #tpu.memory_space<vmem>>, %arg13: memref<1x64xf32, #tpu.memory_space<vmem>>, %arg14: memref<64x32xf32, #tpu.memory_space<vmem>>, %arg15: memref<1x32xf32, #tpu.memory_space<vmem>>, %arg16: memref<1x32xf32, #tpu.memory_space<vmem>>, %arg17: memref<1x32xf32, #tpu.memory_space<vmem>>, %arg18: memref<16x32xf32, #tpu.memory_space<vmem>>) attributes {dimension_semantics = [], scalar_prefetch = 0 : i64, scratch_operands = 0 : i64, tpu.core_type = #tpu.core_type<tc>} {
    %c0 = arith.constant 0 : index
    %c0_0 = arith.constant 0 : index
    %0 = vector.load %arg0[%c0, %c0_0] : memref<16x32xf32, #tpu.memory_space<vmem>>, vector<16x32xf32>
    %c0_1 = arith.constant 0 : index
    %c0_2 = arith.constant 0 : index
    %1 = vector.load %arg1[%c0_1, %c0_2] : memref<16x32xf32, #tpu.memory_space<vmem>>, vector<16x32xf32>
    %2 = arith.addf %0, %1 : vector<16x32xf32>
    %c0_3 = arith.constant 0 : index
    %c0_4 = arith.constant 0 : index
    %3 = vector.load %arg2[%c0_3, %c0_4] : memref<32x32xf32, #tpu.memory_space<vmem>>, vector<32x32xf32>
    %cst = arith.constant dense<0.000000e+00> : vector<16x32xf32>
    %4 = tpu.matmul %2, %3, %cst {dimension_numbers = #tpu.dot_dimension_numbers<[1], [0], [0], [1], [0, 0, 1, 1], [], []>} : vector<16x32xf32>, vector<32x32xf32>, vector<16x32xf32> -> vector<16x32xf32>
    %c0_5 = arith.constant 0 : index
    %c0_6 = arith.constant 0 : index
    %5 = vector.load %arg3[%c0_5, %c0_6] : memref<1x32xf32, #tpu.memory_space<vmem>>, vector<1x32xf32>
    %6 = vector.broadcast %5 : vector<1x32xf32> to vector<16x32xf32>
    %7 = arith.addf %4, %6 : vector<16x32xf32>
    %c0_7 = arith.constant 0 : index
    %c0_8 = arith.constant 0 : index
    %8 = vector.load %arg4[%c0_7, %c0_8] : memref<32x32xf32, #tpu.memory_space<vmem>>, vector<32x32xf32>
    %cst_9 = arith.constant dense<0.000000e+00> : vector<16x32xf32>
    %9 = tpu.matmul %2, %8, %cst_9 {dimension_numbers = #tpu.dot_dimension_numbers<[1], [0], [0], [1], [0, 0, 1, 1], [], []>} : vector<16x32xf32>, vector<32x32xf32>, vector<16x32xf32> -> vector<16x32xf32>
    %c0_10 = arith.constant 0 : index
    %c0_11 = arith.constant 0 : index
    %10 = vector.load %arg5[%c0_10, %c0_11] : memref<1x32xf32, #tpu.memory_space<vmem>>, vector<1x32xf32>
    %11 = vector.broadcast %10 : vector<1x32xf32> to vector<16x32xf32>
    %12 = arith.addf %9, %11 : vector<16x32xf32>
    %c0_12 = arith.constant 0 : index
    %c0_13 = arith.constant 0 : index
    %13 = vector.load %arg6[%c0_12, %c0_13] : memref<32x32xf32, #tpu.memory_space<vmem>>, vector<32x32xf32>
    %cst_14 = arith.constant dense<0.000000e+00> : vector<16x32xf32>
    %14 = tpu.matmul %0, %13, %cst_14 {dimension_numbers = #tpu.dot_dimension_numbers<[1], [0], [0], [1], [0, 0, 1, 1], [], []>} : vector<16x32xf32>, vector<32x32xf32>, vector<16x32xf32> -> vector<16x32xf32>
    %c0_15 = arith.constant 0 : index
    %c0_16 = arith.constant 0 : index
    %15 = vector.load %arg7[%c0_15, %c0_16] : memref<1x32xf32, #tpu.memory_space<vmem>>, vector<1x32xf32>
    %16 = vector.broadcast %15 : vector<1x32xf32> to vector<16x32xf32>
    %17 = arith.addf %14, %16 : vector<16x32xf32>
    %18 = vector.shape_cast %7 : vector<16x32xf32> to vector<2x8x32xf32>
    %19 = tpu.transpose %18, [0, 2, 1] : vector<2x8x32xf32> -> vector<2x32x8xf32>
    %20 = vector.shape_cast %19 : vector<2x32x8xf32> to vector<8x8x8xf32>
    %21 = tpu.transpose %20, [0, 2, 1] : vector<8x8x8xf32> -> vector<8x8x8xf32>
    %22 = vector.shape_cast %12 : vector<16x32xf32> to vector<2x8x32xf32>
    %23 = tpu.transpose %22, [0, 2, 1] : vector<2x8x32xf32> -> vector<2x32x8xf32>
    %24 = vector.shape_cast %23 : vector<2x32x8xf32> to vector<8x8x8xf32>
    %25 = tpu.transpose %24, [0, 2, 1] : vector<8x8x8xf32> -> vector<8x8x8xf32>
    %26 = vector.shape_cast %17 : vector<16x32xf32> to vector<2x8x32xf32>
    %27 = tpu.transpose %26, [0, 2, 1] : vector<2x8x32xf32> -> vector<2x32x8xf32>
    %28 = vector.shape_cast %27 : vector<2x32x8xf32> to vector<8x8x8xf32>
    %29 = tpu.transpose %28, [0, 2, 1] : vector<8x8x8xf32> -> vector<8x8x8xf32>
    "tpu.trace_start"() <{level = 10 : i32, message = "nsd,ntd->nst"}> : () -> ()
    %cst_17 = arith.constant dense<0.000000e+00> : vector<8x8x8xf32>
    %30 = tpu.matmul %21, %25, %cst_17 {dimension_numbers = #tpu.dot_dimension_numbers<[2], [2], [1], [1], [0, 0, 0, 1, 1, 1], [0], [0]>} : vector<8x8x8xf32>, vector<8x8x8xf32>, vector<8x8x8xf32> -> vector<8x8x8xf32>
    "tpu.trace_stop"() : () -> ()
    %cst_18 = arith.constant dense<0xFF800000> : vector<8x8xf32>
    %31 = vector.multi_reduction <maximumf>, %30, %cst_18 [2] : vector<8x8x8xf32> to vector<8x8xf32>
    %32 = vector.shape_cast %31 : vector<8x8xf32> to vector<8x8x1xf32>
    %33 = vector.broadcast %32 : vector<8x8x1xf32> to vector<8x8x8xf32>
    %34 = arith.subf %30, %33 : vector<8x8x8xf32>
    %35 = math.exp %34 : vector<8x8x8xf32>
    %cst_19 = arith.constant dense<0.000000e+00> : vector<8x8xf32>
    %36 = vector.multi_reduction <add>, %35, %cst_19 [2] : vector<8x8x8xf32> to vector<8x8xf32>
    %37 = vector.shape_cast %36 : vector<8x8xf32> to vector<8x8x1xf32>
    %38 = tpu.reciprocal %37 {approx = true} : vector<8x8x1xf32> -> vector<8x8x1xf32>
    %39 = vector.broadcast %38 : vector<8x8x1xf32> to vector<8x8x8xf32>
    %40 = arith.mulf %35, %39 : vector<8x8x8xf32>
    "tpu.trace_start"() <{level = 10 : i32, message = "nst,ntd->nsd"}> : () -> ()
    %cst_20 = arith.constant dense<0.000000e+00> : vector<8x8x8xf32>
    %41 = tpu.matmul %40, %29, %cst_20 {dimension_numbers = #tpu.dot_dimension_numbers<[2], [1], [1], [2], [0, 0, 0, 1, 1, 2], [0], [0]>} : vector<8x8x8xf32>, vector<8x8x8xf32>, vector<8x8x8xf32> -> vector<8x8x8xf32>
    "tpu.trace_stop"() : () -> ()
    %42 = tpu.transpose %41, [0, 2, 1] : vector<8x8x8xf32> -> vector<8x8x8xf32>
    %43 = vector.shape_cast %42 : vector<8x8x8xf32> to vector<2x32x8xf32>
    %44 = tpu.transpose %43, [0, 2, 1] : vector<2x32x8xf32> -> vector<2x8x32xf32>
    %45 = vector.shape_cast %44 : vector<2x8x32xf32> to vector<16x32xf32>
    %c0_21 = arith.constant 0 : index
    %c0_22 = arith.constant 0 : index
    %46 = vector.load %arg8[%c0_21, %c0_22] : memref<32x32xf32, #tpu.memory_space<vmem>>, vector<32x32xf32>
    %cst_23 = arith.constant dense<0.000000e+00> : vector<16x32xf32>
    %47 = tpu.matmul %45, %46, %cst_23 {dimension_numbers = #tpu.dot_dimension_numbers<[1], [0], [0], [1], [0, 0, 1, 1], [], []>} : vector<16x32xf32>, vector<32x32xf32>, vector<16x32xf32> -> vector<16x32xf32>
    %c0_24 = arith.constant 0 : index
    %c0_25 = arith.constant 0 : index
    %48 = vector.load %arg9[%c0_24, %c0_25] : memref<1x32xf32, #tpu.memory_space<vmem>>, vector<1x32xf32>
    %49 = vector.broadcast %48 : vector<1x32xf32> to vector<16x32xf32>
    %50 = arith.addf %47, %49 : vector<16x32xf32>
    %51 = arith.addf %0, %50 : vector<16x32xf32>
    %cst_26 = arith.constant dense<0.000000e+00> : vector<16xf32>
    %52 = vector.multi_reduction <add>, %51, %cst_26 [1] : vector<16x32xf32> to vector<16xf32>
    %53 = vector.shape_cast %52 : vector<16xf32> to vector<16x1xf32>
    %cst_27 = arith.constant 3.200000e+01 : f32
    %54 = vector.broadcast %cst_27 : f32 to vector<16x1xf32>
    %55 = arith.divf %53, %54 : vector<16x1xf32>
    %56 = vector.broadcast %55 : vector<16x1xf32> to vector<16x32xf32>
    %57 = arith.subf %51, %56 : vector<16x32xf32>
    %58 = arith.mulf %57, %57 : vector<16x32xf32>
    %cst_28 = arith.constant dense<0.000000e+00> : vector<16xf32>
    %59 = vector.multi_reduction <add>, %58, %cst_28 [1] : vector<16x32xf32> to vector<16xf32>
    %60 = vector.shape_cast %59 : vector<16xf32> to vector<16x1xf32>
    %cst_29 = arith.constant 3.200000e+01 : f32
    %61 = vector.broadcast %cst_29 : f32 to vector<16x1xf32>
    %62 = arith.divf %60, %61 : vector<16x1xf32>
    %63 = vector.broadcast %55 : vector<16x1xf32> to vector<16x32xf32>
    %64 = arith.subf %51, %63 : vector<16x32xf32>
    %cst_30 = arith.constant 9.99999974E-6 : f32
    %65 = vector.broadcast %cst_30 : f32 to vector<16x1xf32>
    %66 = arith.addf %62, %65 : vector<16x1xf32>
    %67 = math.rsqrt %66 : vector<16x1xf32>
    %68 = vector.broadcast %67 : vector<16x1xf32> to vector<16x32xf32>
    %69 = arith.mulf %64, %68 : vector<16x32xf32>
    %c0_31 = arith.constant 0 : index
    %c0_32 = arith.constant 0 : index
    %70 = vector.load %arg10[%c0_31, %c0_32] : memref<1x32xf32, #tpu.memory_space<vmem>>, vector<1x32xf32>
    %71 = vector.broadcast %70 : vector<1x32xf32> to vector<16x32xf32>
    %72 = arith.mulf %69, %71 : vector<16x32xf32>
    %c0_33 = arith.constant 0 : index
    %c0_34 = arith.constant 0 : index
    %73 = vector.load %arg11[%c0_33, %c0_34] : memref<1x32xf32, #tpu.memory_space<vmem>>, vector<1x32xf32>
    %74 = vector.broadcast %73 : vector<1x32xf32> to vector<16x32xf32>
    %75 = arith.addf %72, %74 : vector<16x32xf32>
    %c0_35 = arith.constant 0 : index
    %c0_36 = arith.constant 0 : index
    %76 = vector.load %arg12[%c0_35, %c0_36] : memref<32x64xf32, #tpu.memory_space<vmem>>, vector<32x64xf32>
    %cst_37 = arith.constant dense<0.000000e+00> : vector<16x64xf32>
    %77 = tpu.matmul %75, %76, %cst_37 {dimension_numbers = #tpu.dot_dimension_numbers<[1], [0], [0], [1], [0, 0, 1, 1], [], []>} : vector<16x32xf32>, vector<32x64xf32>, vector<16x64xf32> -> vector<16x64xf32>
    %c0_38 = arith.constant 0 : index
    %c0_39 = arith.constant 0 : index
    %78 = vector.load %arg13[%c0_38, %c0_39] : memref<1x64xf32, #tpu.memory_space<vmem>>, vector<1x64xf32>
    %79 = vector.broadcast %78 : vector<1x64xf32> to vector<16x64xf32>
    %80 = arith.addf %77, %79 : vector<16x64xf32>
    %cst_40 = arith.constant 0.000000e+00 : f32
    %81 = vector.broadcast %cst_40 : f32 to vector<16x64xf32>
    %82 = arith.maximumf %80, %81 : vector<16x64xf32>
    %c0_41 = arith.constant 0 : index
    %c0_42 = arith.constant 0 : index
    %83 = vector.load %arg14[%c0_41, %c0_42] : memref<64x32xf32, #tpu.memory_space<vmem>>, vector<64x32xf32>
    %cst_43 = arith.constant dense<0.000000e+00> : vector<16x32xf32>
    %84 = tpu.matmul %82, %83, %cst_43 {dimension_numbers = #tpu.dot_dimension_numbers<[1], [0], [0], [1], [0, 0, 1, 1], [], []>} : vector<16x64xf32>, vector<64x32xf32>, vector<16x32xf32> -> vector<16x32xf32>
    %c0_44 = arith.constant 0 : index
    %c0_45 = arith.constant 0 : index
    %85 = vector.load %arg15[%c0_44, %c0_45] : memref<1x32xf32, #tpu.memory_space<vmem>>, vector<1x32xf32>
    %86 = vector.broadcast %85 : vector<1x32xf32> to vector<16x32xf32>
    %87 = arith.addf %84, %86 : vector<16x32xf32>
    %88 = arith.addf %75, %87 : vector<16x32xf32>
    %cst_46 = arith.constant dense<0.000000e+00> : vector<16xf32>
    %89 = vector.multi_reduction <add>, %88, %cst_46 [1] : vector<16x32xf32> to vector<16xf32>
    %90 = vector.shape_cast %89 : vector<16xf32> to vector<16x1xf32>
    %cst_47 = arith.constant 3.200000e+01 : f32
    %91 = vector.broadcast %cst_47 : f32 to vector<16x1xf32>
    %92 = arith.divf %90, %91 : vector<16x1xf32>
    %93 = vector.broadcast %92 : vector<16x1xf32> to vector<16x32xf32>
    %94 = arith.subf %88, %93 : vector<16x32xf32>
    %95 = arith.mulf %94, %94 : vector<16x32xf32>
    %cst_48 = arith.constant dense<0.000000e+00> : vector<16xf32>
    %96 = vector.multi_reduction <add>, %95, %cst_48 [1] : vector<16x32xf32> to vector<16xf32>
    %97 = vector.shape_cast %96 : vector<16xf32> to vector<16x1xf32>
    %cst_49 = arith.constant 3.200000e+01 : f32
    %98 = vector.broadcast %cst_49 : f32 to vector<16x1xf32>
    %99 = arith.divf %97, %98 : vector<16x1xf32>
    %100 = vector.broadcast %92 : vector<16x1xf32> to vector<16x32xf32>
    %101 = arith.subf %88, %100 : vector<16x32xf32>
    %cst_50 = arith.constant 9.99999974E-6 : f32
    %102 = vector.broadcast %cst_50 : f32 to vector<16x1xf32>
    %103 = arith.addf %99, %102 : vector<16x1xf32>
    %104 = math.rsqrt %103 : vector<16x1xf32>
    %105 = vector.broadcast %104 : vector<16x1xf32> to vector<16x32xf32>
    %106 = arith.mulf %101, %105 : vector<16x32xf32>
    %c0_51 = arith.constant 0 : index
    %c0_52 = arith.constant 0 : index
    %107 = vector.load %arg16[%c0_51, %c0_52] : memref<1x32xf32, #tpu.memory_space<vmem>>, vector<1x32xf32>
    %108 = vector.broadcast %107 : vector<1x32xf32> to vector<16x32xf32>
    %109 = arith.mulf %106, %108 : vector<16x32xf32>
    %c0_53 = arith.constant 0 : index
    %c0_54 = arith.constant 0 : index
    %110 = vector.load %arg17[%c0_53, %c0_54] : memref<1x32xf32, #tpu.memory_space<vmem>>, vector<1x32xf32>
    %111 = vector.broadcast %110 : vector<1x32xf32> to vector<16x32xf32>
    %112 = arith.addf %109, %111 : vector<16x32xf32>
    %c0_55 = arith.constant 0 : index
    %c0_56 = arith.constant 0 : index
    %113 = vector.load %arg18[%c0_55, %c0_56] : memref<16x32xf32, #tpu.memory_space<vmem>>, vector<16x32xf32>
    tpu.vector_store %arg18[%c0_55, %c0_56], %112 {strides = array<i32>} : memref<16x32xf32, #tpu.memory_space<vmem>>, vector<16x32xf32>,
    return
  }
}

</mosaic_0001>

<bundles_post_ra>
// kernel: transformer_encoder_layer.1
= control target key start
LH: loop header
LB: loop body
LE: loop exit
PB: predicated region body
PF: predicated region fallthrough
CT: control target
= control target key end

     0   :  { %vm76_vm0 = vcmask 261120   ;;  %v3137_v30 = vmov 0.0   ;;  %vm3138_vm1 = vmmov 0   ;;  %vm784_vm2 = vcmask 64512   ;;  %s3518_s2 = inlined_call_operand.vmem [shape: f32[32,32], index: 2, kind: input, shape index: {}]   ;;  %s3519_s0 = inlined_call_operand.vmem [shape: f32[16,32], index: 0, kind: input, shape index: {}]   ;;  %s3520_s1 = inlined_call_operand.vmem [shape: f32[16,32], index: 1, kind: input, shape index: {}]   ;;  %s3521_s4 = inlined_call_operand.vmem [shape: f32[32,32], index: 4, kind: input, shape index: {}]   ;;  %s3522_s3 = inlined_call_operand.vmem [shape: f32[1,32], index: 3, kind: input, shape index: {}]   ;;  %s3523_s5 = inlined_call_operand.vmem [shape: f32[1,32], index: 5, kind: input, shape index: {}]   ;;  %s3524_s6 = inlined_call_operand.vmem [shape: f32[32,32], index: 6, kind: input, shape index: {}]   ;;  %s3525_s7 = inlined_call_operand.vmem [shape: f32[1,32], index: 7, kind: input, shape index: {}]   ;;  %s3526_s8 = inlined_call_operand.vmem [shape: f32[32,32], index: 8, kind: input, shape index: {}]   ;;  %s3527_s9 = inlined_call_operand.vmem [shape: f32[1,32], index: 9, kind: input, shape index: {}]   ;;  %s3528_s12 = inlined_call_operand.vmem [shape: f32[32,64], index: 12, kind: input, shape index: {}]   ;;  %s3529_s14 = inlined_call_operand.vmem [shape: f32[64,32], index: 14, kind: input, shape index: {}]   ;;  %s3530_s10 = inlined_call_operand.vmem [shape: f32[1,32], index: 10, kind: input, shape index: {}]   ;;  %s3531_s11 = inlined_call_operand.vmem [shape: f32[1,32], index: 11, kind: input, shape index: {}]   ;;  %s3532_s13 = inlined_call_operand.vmem [shape: f32[1,64], index: 13, kind: input, shape index: {}]   ;;  %s3533_s15 = inlined_call_operand.vmem [shape: f32[1,32], index: 15, kind: input, shape index: {}]   ;;  %s3534_s16 = inlined_call_operand.vmem [shape: f32[1,32], index: 16, kind: input, shape index: {}]   ;;  %s3535_s17 = inlined_call_operand.vmem [shape: f32[1,32], index: 17, kind: input, shape index: {}]   ;;  %s3536_s18 = inlined_call_operand.vmem [shape: f32[16,32], index: 18, kind: output, shape index: {}]  }
   0x1   :  { %3540 = sst [smem:[#allocation2_spill]] %s3518_s2  ;;  %v158_v8 = vld [vmem:[%s3521_s4] sm:$0xff]  ;;  %v159_v10 = vld [vmem:[%s3521_s4 + $0x8] sm:$0xff]  ;;  %v160_v14 = vld [vmem:[%s3521_s4 + $0x10] sm:$0xff]  ;;  %vm2633_vm3 = vcmask 523264  }
   0x2   :  { %3541 = sst [smem:[#allocation3_spill]] %s3519_s0  ;;  %s3543_s29 = sld [smem:[#allocation2_spill]]  ;;  %v3047_v13 = vpack.c.bf16 %v159_v10, %v158_v8  ;;  %v161_v15 = vld [vmem:[%s3521_s4 + $0x18] sm:$0xff]  ;;  %v2767_v18 = vld [vmem:[%s3522_s3] ss:$0 sm:$0xff]  ;;  %v245_v29 = vld [vmem:[%s3524_s6 + $0x8] sm:$0xff] }
   0x3   :  { %3542 = sst [smem:[#allocation4_spill]] %s3520_s1  ;;  %s3544_s23 = sld [smem:[#allocation3_spill]]  ;;  %v3051_v17 = vpack.c.bf16 %v161_v15, %v160_v14  ;;  %v2770_v22 = vld [vmem:[%s3523_s5] ss:$0 sm:$0xff]  ;;  %v246_v32 = vld [vmem:[%s3524_s6 + $0x10] sm:$0xff]  ;;  %v247_v33 = vld [vmem:[%s3524_s6 + $0x18] sm:$0xff] }
   0x4   :  { %s3545_s26 = sld [smem:[#allocation4_spill]]  ;;  %v244_v28 = vld [vmem:[%s3524_s6] sm:$0xff]  ;;  %v3059_v34 = vpack.c.bf16 %v247_v33, %v246_v32 }
   0x5   :  { %v3055_v31 = vpack.c.bf16 %v245_v29, %v244_v28 }
   0x7   :  { %3056 = vmatprep.subr.bf16.mxu0 %v3055_v31 }
   0x8   :  { %v65_v0 = vld [vmem:[%s3543_s29] sm:$0xff]  ;;  %v66_v1 = vld [vmem:[%s3543_s29 + $0x8] sm:$0xff]  ;;  %v67_v2 = vld [vmem:[%s3543_s29 + $0x10] sm:$0xff]  ;;  %3058 = vmatpush3.bf16.msra.mxu0 %v3055_v31 }
   0x9   :  { %v3039_v3 = vpack.c.bf16 %v66_v1, %v65_v0  ;;  %v68_v4 = vld [vmem:[%s3543_s29 + $0x18] sm:$0xff]  ;;  %v3249_v5 = vld [vmem:[%s3544_s23] sm:$0xff]  ;;  %v3266_v11 = vld [vmem:[%s3544_s23 + $0x8] sm:$0xff]  ;;  %3060 = vmatprep.subr.bf16.mxu0 %v3059_v34 }
   0xa   :  { %v3043_v6 = vpack.c.bf16 %v68_v4, %v67_v2  ;;  %v61_v7 = vld [vmem:[%s3545_s26] sm:$0xff]  ;;  %2915 = vmatprep.mubr.msk.f32.mxu0 %vm76_vm0, %v3249_v5  ;;  %v62_v12 = vld [vmem:[%s3545_s26 + $0x8] sm:$0xff] }
   0xb   :  { %3040 = vmatprep.subr.bf16.mxu1 %v3039_v3  ;;  %v63_v9 = vadd.f32 %v61_v7, %v3249_v5  ;;  %v64_v16 = vadd.f32 %v62_v12, %v3266_v11 }
   0xc   :  { %3042 = vmatpush3.bf16.msra.mxu1 %v3039_v3  ;;  %3062 = vmatpush3.bf16.msra.mxu0 %v3059_v34 }
   0xd   :  { %3044 = vmatprep.subr.bf16.mxu1 %v3043_v6  ;;  %2893 = vmatprep.mubr.msk.f32.mxu1 %vm76_vm0, %v63_v9 }
   0xe   :  { %2928 = vmatprep.subr.mxu0 %v3137_v30 }
   0xf   :  { %2916 = vmatmul.mubr.msk.f32.vlgmr.msra.gmra.mrb[0].mxu0 %vm76_vm0, %v3266_v11 }
  0x10   :  { %3046 = vmatpush3.bf16.msra.mxu1 %v3043_v6  ;;  %2930 = vmatprep.mubr.msk.f32.mxu0 %vm3138_vm1, %v3137_v30 }
  0x11   :  { %3048 = vmatprep.subr.bf16.mxu1 %v3047_v13 }
  0x13   :  { %2894 = vmatmul.mubr.msk.f32.vlgmr.msra.gmra.mrb[0].mxu1 %vm76_vm0, %v64_v16 }
  0x14   :  { %3050 = vmatpush3.bf16.msra.mxu1 %v3047_v13  ;;  %2904 = vmatprep.mubr.msk.f32.mxu1 %vm76_vm0, %v63_v9 }
  0x15   :  { %3052 = vmatprep.subr.bf16.mxu1 %v3051_v17 }
  0x18   :  { %3054 = vmatpush3.bf16.msra.mxu1 %v3051_v17 }
  0x19   :  { %2918 = vmatprep.subr.mxu1 %v3137_v30 }
  0x1b   :  { %2905 = vmatmul.mubr.msk.f32.vlgmr.msra.gmra.mrb[2].mxu1 %vm76_vm0, %v64_v16 }
  0x1c   :  { %2920 = vmatprep.mubr.msk.f32.mxu1 %vm3138_vm1, %v3137_v30 }
  0xe2   :  { %v3340_v59 = vpop.f32.mrb[0].mxu0 }
  0xe3   :  { %v3342_v60 = vpop.f32.mrb[1].mxu0 }
  0xe6   :  { %v2895_v19 = vpop.f32.mrb[0].mxu1 }
  0xe7   :  { %v149_v20 = vpop.f32.mrb[1].mxu1  ;;  %v155_v26 = vadd.f32 %v2895_v19, %v2767_v18 }
  0xe8   :  { %v150_v21 = vadd.f32 %v2767_v18, %v149_v20 }
  0xea   :  { %336 = vxpose.xlu0.b32.start.end [1/1] (short) (narrow) %v150_v21, 32 }
  0xee   :  { %v2906_v23 = vpop.f32.mrb[2].mxu1 }
  0xef   :  { %v241_v24 = vadd.f32 %v2906_v23, %v2770_v22  ;;  %v235_v25 = vpop.f32.mrb[3].mxu1 }
  0xf0   :  { %v236_v27 = vadd.f32 %v2770_v22, %v235_v25 }
  0xf1   :  { %688 = vxpose.xlu1.b32.start.end [1/1] (short) (narrow) %v241_v24, 32 }
  0xf7   :  { %368 = vxpose.xlu0.b32.start.end [1/1] (short) (narrow) %v155_v26, 32 }
  0xfe   :  { %656 = vxpose.xlu1.b32.start.end [1/1] (short) (narrow) %v236_v27, 32 }
 0x16a   :  { %v352_v35 = vpop.trf.xlu0 }
 0x16b   :  { %400 = vxpose.xlu1.b32.start.end [1/1] (short) (narrow) %v352_v35, 8 }
 0x16e   :  { %v353_v36 = vpop.trf.xlu0 }
 0x16f   :  { %432 = vxpose.xlu0.b32.start.end [1/1] (short) (narrow) %v353_v36, 8 }
 0x171   :  { %v704_v37 = vpop.trf.xlu1 }
 0x172   :  { %v354_v38 = vpop.trf.xlu0 }
 0x173   :  { %464 = vxpose.xlu1.b32.start.end [1/1] (short) (narrow) %v354_v38, 8 }
 0x175   :  { %v705_v39 = vpop.trf.xlu1 }
 0x176   :  { %v355_v40 = vpop.trf.xlu0 }
 0x177   :  { %496 = vxpose.xlu1.b32.start.end [1/1] (short) (narrow) %v355_v40, 8 }
 0x179   :  { %v706_v41 = vpop.trf.xlu1 }
 0x17a   :  { %v384_v42 = vpop.trf.xlu0 }
 0x17b   :  { %528 = vxpose.xlu1.b32.start.end [1/1] (short) (narrow) %v384_v42, 8 }
 0x17d   :  { %v707_v43 = vpop.trf.xlu1 }
 0x17e   :  { %v385_v44 = vpop.trf.xlu0 }
 0x17f   :  { %560 = vxpose.xlu0.b32.start.end [1/1] (short) (narrow) %v385_v44, 8 }
 0x181   :  { %v672_v45 = vpop.trf.xlu1 }
 0x182   :  { %v386_v46 = vpop.trf.xlu0  ;;  %2919 = vmatpush3.msra.mxu1 %v672_v45 }
 0x183   :  { %592 = vxpose.xlu0.b32.start.end [1/1] (short) (narrow) %v386_v46, 8  ;;  %2923 = vmatprep.subr.mxu1 %v3137_v30 }
 0x185   :  { %v673_v47 = vpop.trf.xlu1 }
 0x186   :  { %v387_v48 = vpop.trf.xlu0 }
 0x187   :  { %624 = vxpose.xlu0.b32.start.end [1/1] (short) (narrow) %v387_v48, 8 }
 0x189   :  { %v674_v49 = vpop.trf.xlu1 }
 0x18a   :  { %2929 = vmatpush3.msra.mxu0 %v674_v49 }
 0x18b   :  { %2938 = vmatprep.subr.mxu0 %v3137_v30 }
 0x18d   :  { %v675_v50 = vpop.trf.xlu1 }
 0x1eb   :  { %v416_v51 = vpop.trf.xlu1 }
 0x1ec   :  { %2921 = vmatmul.mubr.msk.f32.vlgmr.msra.gmra.mrb[4].mxu1 %vm784_vm2, %v416_v51 }
 0x1ed   :  { %2924 = vmatpush3.msra.mxu1 %v673_v47  ;;  %2925 = vmatprep.mubr.msk.f32.mxu1 %vm3138_vm1, %v3137_v30 }
 0x1ee   :  { %2933 = vmatprep.subr.mxu1 %v3137_v30 }
 0x1ef   :  { %v448_v52 = vpop.trf.xlu0 }
 0x1f0   :  { %2926 = vmatmul.mubr.msk.f32.vlgmr.msra.gmra.mrb[6].mxu1 %vm784_vm2, %v448_v52 }
 0x1f1   :  { %2934 = vmatpush3.msra.mxu1 %v675_v50  ;;  %2935 = vmatprep.mubr.msk.f32.mxu1 %vm3138_vm1, %v3137_v30 }
 0x1f2   :  { %2943 = vmatprep.subr.mxu1 %v3137_v30 }
 0x1f3   :  { %v480_v53 = vpop.trf.xlu1 }
 0x1f4   :  { %2931 = vmatmul.mubr.msk.f32.vlgmr.msra.gmra.mrb[2].mxu0 %vm784_vm2, %v480_v53 }
 0x1f5   :  { %2939 = vmatpush3.msra.mxu0 %v704_v37  ;;  %2940 = vmatprep.mubr.msk.f32.mxu0 %vm3138_vm1, %v3137_v30 }
 0x1f6   :  { %2948 = vmatprep.subr.mxu0 %v3137_v30 }
 0x1f7   :  { %v512_v54 = vpop.trf.xlu1 }
 0x1f8   :  { %2936 = vmatmul.mubr.msk.f32.vlgmr.msra.gmra.mrb[8].mxu1 %vm784_vm2, %v512_v54 }
 0x1f9   :  { %2944 = vmatpush3.msra.mxu1 %v705_v39  ;;  %2945 = vmatprep.mubr.msk.f32.mxu1 %vm3138_vm1, %v3137_v30 }
 0x1fa   :  { %2953 = vmatprep.subr.mxu1 %v3137_v30 }
 0x1fb   :  { %v544_v55 = vpop.trf.xlu1 }
 0x1fc   :  { %2941 = vmatmul.mubr.msk.f32.vlgmr.msra.gmra.mrb[4].mxu0 %vm784_vm2, %v544_v55 }
 0x1fd   :  { %2949 = vmatpush3.msra.mxu0 %v706_v41  ;;  %2950 = vmatprep.mubr.msk.f32.mxu0 %vm3138_vm1, %v3137_v30 }
 0x1fe   :  { %2958 = vmatprep.subr.mxu0 %v3137_v30 }
 0x1ff   :  { %v576_v56 = vpop.trf.xlu0 }
 0x200   :  { %2946 = vmatmul.mubr.msk.f32.vlgmr.msra.gmra.mrb[10].mxu1 %vm784_vm2, %v576_v56 }
 0x201   :  { %2954 = vmatpush3.msra.mxu1 %v707_v43  ;;  %2955 = vmatprep.mubr.msk.f32.mxu1 %vm3138_vm1, %v3137_v30 }
 0x202   :  { %2963 = vmatprep.subr.mxu1 %v3137_v30 }
 0x203   :  { %v608_v57 = vpop.trf.xlu0 }
 0x204   :  { %2951 = vmatmul.mubr.msk.f32.vlgmr.msra.gmra.mrb[6].mxu0 %vm784_vm2, %v608_v57 }
 0x205   :  { %2960 = vmatprep.mubr.msk.f32.mxu0 %vm3138_vm1, %v3137_v30 }
 0x207   :  { %v640_v58 = vpop.trf.xlu0 }
 0x208   :  { %2956 = vmatmul.mubr.msk.f32.vlgmr.msra.gmra.mrb[12].mxu1 %vm784_vm2, %v640_v58 }
 0x209   :  { %2965 = vmatprep.mubr.msk.f32.mxu1 %vm3138_vm1, %v3137_v30 }
 0x2bf   :  { %v854_v61 = vpop.f32.mrb[4].mxu1 }
 0x2c0   :  { %v1369_v62 = vsel %vm784_vm2, %v854_v61, -inf  ;;  %v2922_v63 = vpop.f32.mrb[5].mxu1 }
 0x2c1   :  { %1370 = vmax.xlane.f32.xlu0 %v1369_v62 }
 0x2c3   :  { %v927_v0 = vpop.f32.mrb[6].mxu1 }
 0x2c4   :  { %v1372_v1 = vsel %vm784_vm2, %v927_v0, -inf  ;;  %v2927_v2 = vpop.f32.mrb[7].mxu1 }
 0x2c5   :  { %1373 = vmax.xlane.f32.xlu1 %v1372_v1  ;;  %v2773_v2 = vld [vmem:[%s3525_s7] ss:$0 sm:$0xff] }
 0x2c7   :  { %v1000_v3 = vpop.f32.mrb[2].mxu0 }
 0x2c8   :  { %v1375_v4 = vsel %vm784_vm2, %v1000_v3, -inf  ;;  %v2932_v6 = vpop.f32.mrb[3].mxu0 }
 0x2c9   :  { %1376 = vmax.xlane.f32.xlu1 %v1375_v4  ;;  %v333_v4 = vadd.f32 %v3340_v59, %v2773_v2 }
 0x2cb   :  { %v1073_v7 = vpop.f32.mrb[8].mxu1 }
 0x2cc   :  { %v1378_v8 = vsel %vm784_vm2, %v1073_v7, -inf  ;;  %v2937_v9 = vpop.f32.mrb[9].mxu1 }
 0x2cd   :  { %1379 = vmax.xlane.f32.xlu1 %v1378_v8 }
 0x2cf   :  { %v1146_v10 = vpop.f32.mrb[4].mxu0 }
 0x2d0   :  { %v1381_v12 = vsel %vm784_vm2, %v1146_v10, -inf  ;;  %v2942_v13 = vpop.f32.mrb[5].mxu0 }
 0x2d1   :  { %1382 = vmax.xlane.f32.xlu0 %v1381_v12 }
 0x2d3   :  { %v1219_v14 = vpop.f32.mrb[10].mxu1 }
 0x2d4   :  { %v2947_v15 = vpop.f32.mrb[11].mxu1  ;;  %v1384_v16 = vsel %vm784_vm2, %v1219_v14, -inf }
 0x2d5   :  { %1385 = vmax.xlane.f32.xlu1 %v1384_v16 }
 0x2d7   :  { %v1292_v17 = vpop.f32.mrb[6].mxu0 }
 0x2d8   :  { %v2952_v18 = vpop.f32.mrb[7].mxu0  ;;  %v1387_v19 = vsel %vm784_vm2, %v1292_v17, -inf }
 0x2d9   :  { %1388 = vmax.xlane.f32.xlu0 %v1387_v19 }
 0x2db   :  { %v1365_v20 = vpop.f32.mrb[12].mxu1 }
 0x2dc   :  { %v1390_v21 = vsel %vm784_vm2, %v1365_v20, -inf  ;;  %v2957_v22 = vpop.f32.mrb[13].mxu1 }
 0x2dd   :  { %1391 = vmax.xlane.f32.xlu1 %v1390_v21 }
 0x34e   :  { %v1371_v23 = vpop.xlane.xlu0 %1370 }
 0x34f   :  { %v1393_v24 = vsub.f32 %v854_v61, %v1371_v23 }
 0x351   :  { %v1401_v25 = vmul.f32 1.442695, %v1393_v24 }
 0x352   :  { %v1374_v26 = vpop.xlane.xlu1 %1373 }
 0x353   :  { %3097 = vpow2.f32 %v1401_v25  ;;  %v1394_v27 = vsub.f32 %v927_v0, %v1374_v26 }
 0x355   :  { %v1403_v28 = vmul.f32 1.442695, %v1394_v27 }
 0x356   :  { %v1377_v29 = vpop.xlane.xlu1 %1376 }
 0x357   :  { %3099 = vpow2.f32 %v1403_v28  ;;  %v1395_v31 = vsub.f32 %v1000_v3, %v1377_v29  ;;  %v328_v3 = vadd.f32 %v2773_v2, %v3342_v60 }
 0x359   :  { %v1405_v32 = vmul.f32 1.442695, %v1395_v31 }
 0x35a   :  { %v1380_v33 = vpop.xlane.xlu1 %1379 }
 0x35b   :  { %3101 = vpow2.f32 %v1405_v32  ;;  %v1396_v34 = vsub.f32 %v1073_v7, %v1380_v33 }
 0x35d   :  { %v3098_v35 = vpop.eup %3097  ;;  %v1407_v36 = vmul.f32 1.442695, %v1396_v34 }
 0x35e   :  { %v1383_v37 = vpop.xlane.xlu0 %1382  ;;  %v1417_v38 = vsel %vm784_vm2, %v3098_v35, 0.0 }
 0x35f   :  { %3103 = vpow2.f32 %v1407_v36  ;;  %v1397_v39 = vsub.f32 %v1146_v10, %v1383_v37  ;;  %1418 = vadd.xlane.f32.xlu0 %v1417_v38 }
 0x361   :  { %v3353_v40 = vpop.eup %3099  ;;  %v1409_v41 = vmul.f32 1.442695, %v1397_v39 }
 0x362   :  { %v1386_v42 = vpop.xlane.xlu1 %1385  ;;  %v1420_v43 = vsel %vm784_vm2, %v3353_v40, 0.0 }
 0x363   :  { %3105 = vpow2.f32 %v1409_v41  ;;  %v1398_v44 = vsub.f32 %v1219_v14, %v1386_v42  ;;  %1421 = vadd.xlane.f32.xlu1 %v1420_v43 }
 0x365   :  { %v3357_v45 = vpop.eup %3101  ;;  %v1411_v46 = vmul.f32 1.442695, %v1398_v44 }
 0x366   :  { %v1389_v47 = vpop.xlane.xlu0 %1388  ;;  %v1423_v48 = vsel %vm784_vm2, %v3357_v45, 0.0 }
 0x367   :  { %3107 = vpow2.f32 %v1411_v46  ;;  %v1399_v49 = vsub.f32 %v1292_v17, %v1389_v47  ;;  %1424 = vadd.xlane.f32.xlu0 %v1423_v48 }
 0x369   :  { %v3361_v50 = vpop.eup %3103  ;;  %v1413_v51 = vmul.f32 1.442695, %v1399_v49 }
 0x36a   :  { %v1392_v52 = vpop.xlane.xlu1 %1391  ;;  %v1426_v53 = vsel %vm784_vm2, %v3361_v50, 0.0 }
 0x36b   :  { %3109 = vpow2.f32 %v1413_v51  ;;  %v1400_v54 = vsub.f32 %v1365_v20, %v1392_v52  ;;  %1427 = vadd.xlane.f32.xlu1 %v1426_v53  ;;  %v2385_v53 = vld [vmem:[%s3526_s8] sm:$0xff] }
 0x36d   :  { %v3365_v55 = vpop.eup %3105  ;;  %v1415_v56 = vmul.f32 1.442695, %v1400_v54  ;;  %v2386_v54 = vld [vmem:[%s3526_s8 + $0x8] sm:$0xff] }
 0x36e   :  { %v1429_v57 = vsel %vm784_vm2, %v3365_v55, 0.0 }
 0x36f   :  { %3111 = vpow2.f32 %v1415_v56  ;;  %1430 = vadd.xlane.f32.xlu0 %v1429_v57  ;;  %v3063_v56 = vpack.c.bf16 %v2386_v54, %v2385_v53  ;;  %v2388_v57 = vld [vmem:[%s3526_s8 + $0x18] sm:$0xff] }
 0x371   :  { %v3369_v58 = vpop.eup %3107 }
 0x372   :  { %v1432_v61 = vsel %vm784_vm2, %v3369_v58, 0.0 }
 0x373   :  { %1433 = vadd.xlane.f32.xlu1 %v1432_v61 }
 0x375   :  { %v3373_v62 = vpop.eup %3109 }
 0x376   :  { %v1435_v63 = vsel %vm784_vm2, %v3373_v62, 0.0 }
 0x377   :  { %1436 = vadd.xlane.f32.xlu0 %v1435_v63 }
 0x379   :  { %v3377_v0 = vpop.eup %3111 }
 0x37a   :  { %v1438_v1 = vsel %vm784_vm2, %v3377_v0, 0.0 }
 0x37b   :  { %1439 = vadd.xlane.f32.xlu1 %v1438_v1 }
 0x3a4   :  { %720 = vxpose.xlu0.b32.start.end [1/1] (short) (narrow) %v328_v3, 32 }
 0x3ae   :  { %752 = vxpose.xlu1.b32.start.end [1/1] (short) (narrow) %v333_v4, 32 }
 0x3ec   :  { %v1419_v6 = vpop.xlane.xlu0 %1418 }
 0x3ed   :  { %3113 = vrcp.f32 %v1419_v6 }
 0x3f0   :  { %v1422_v8 = vpop.xlane.xlu1 %1421 }
 0x3f1   :  { %3115 = vrcp.f32 %v1422_v8  ;;  %v2800_v8 = vld [vmem:[%s3527_s9] ss:$0 sm:$0xff] }
 0x3f4   :  { %v1425_v7 = vpop.xlane.xlu0 %1424 }
 0x3f5   :  { %3117 = vrcp.f32 %v1425_v7 }
 0x3f7   :  { %v3114_v13 = vpop.eup %3113 }
 0x3f8   :  { %v1428_v12 = vpop.xlane.xlu1 %1427  ;;  %v1449_v60 = vmul.f32 %v3114_v13, %v3098_v35 }
 0x3f9   :  { %3119 = vrcp.f32 %v1428_v12 }
 0x3fb   :  { %v3116_v59 = vpop.eup %3115 }
 0x3fc   :  { %v1431_v9 = vpop.xlane.xlu0 %1430  ;;  %v1450_v17 = vmul.f32 %v3116_v59, %v3353_v40 }
 0x3fd   :  { %3121 = vrcp.f32 %v1431_v9 }
 0x3ff   :  { %v3118_v19 = vpop.eup %3117 }
 0x400   :  { %v1434_v15 = vpop.xlane.xlu1 %1433  ;;  %v1451_v22 = vmul.f32 %v3118_v19, %v3357_v45 }
 0x401   :  { %3123 = vrcp.f32 %v1434_v15 }
 0x403   :  { %v3120_v21 = vpop.eup %3119 }
 0x404   :  { %v1437_v10 = vpop.xlane.xlu0 %1436  ;;  %v1452_v26 = vmul.f32 %v3120_v21, %v3361_v50 }
 0x405   :  { %3125 = vrcp.f32 %v1437_v10 }
 0x407   :  { %v3122_v24 = vpop.eup %3121 }
 0x408   :  { %v1440_v18 = vpop.xlane.xlu1 %1439  ;;  %v1453_v27 = vmul.f32 %v3122_v24, %v3365_v55  ;;  %v2387_v55 = vld [vmem:[%s3526_s8 + $0x10] sm:$0xff] }
 0x409   :  { %3127 = vrcp.f32 %v1440_v18 }
 0x40b   :  { %v3124_v29 = vpop.eup %3123 }
 0x40c   :  { %v1454_v32 = vmul.f32 %v3124_v29, %v3369_v58  ;;  %v3067_v58 = vpack.c.bf16 %v2388_v57, %v2387_v55  ;;  %v2624_v55 = vld [vmem:[%s3529_s14 + $0x30] sm:$0xff] }
 0x40f   :  { %v3126_v31 = vpop.eup %3125 }
 0x410   :  { %v1455_v34 = vmul.f32 %v3126_v31, %v3373_v62  ;;  %v2618_v31 = vld [vmem:[%s3529_s14] sm:$0xff] }
 0x413   :  { %v3128_v35 = vpop.eup %3127 }
 0x414   :  { %v1456_v37 = vmul.f32 %v3128_v35, %v3377_v0  ;;  %v2621_v35 = vld [vmem:[%s3529_s14 + $0x18] sm:$0xff] }
 0x424   :  { %v736_v14 = vpop.trf.xlu0 }
 0x425   :  { %2959 = vmatpush3.xpose.msk.msra.mxu0 %vm784_vm2, %v736_v14 }
 0x426   :  { %2968 = vmatprep.subr.mxu0 %v3137_v30 }
 0x428   :  { %2961 = vmatmul.mubr.msk.f32.vlgmr.msra.gmra.mrb[8].mxu0 %vm784_vm2, %v1449_v60  ;;  %v737_v16 = vpop.trf.xlu0 }
 0x429   :  { %2964 = vmatpush3.xpose.msk.msra.mxu1 %vm784_vm2, %v737_v16  ;;  %2970 = vmatprep.mubr.msk.f32.mxu0 %vm3138_vm1, %v3137_v30 }
 0x42a   :  { %2973 = vmatprep.subr.mxu1 %v3137_v30 }
 0x42c   :  { %2966 = vmatmul.mubr.msk.f32.vlgmr.msra.gmra.mrb[14].mxu1 %vm784_vm2, %v1450_v17  ;;  %v738_v20 = vpop.trf.xlu0 }
 0x42d   :  { %2969 = vmatpush3.xpose.msk.msra.mxu0 %vm784_vm2, %v738_v20  ;;  %2975 = vmatprep.mubr.msk.f32.mxu1 %vm3138_vm1, %v3137_v30 }
 0x42e   :  { %v768_v23 = vpop.trf.xlu1  ;;  %2978 = vmatprep.subr.mxu0 %v3137_v30 }
 0x430   :  { %2971 = vmatmul.mubr.msk.f32.vlgmr.msra.gmra.mrb[10].mxu0 %vm784_vm2, %v1451_v22  ;;  %v739_v25 = vpop.trf.xlu0 }
 0x431   :  { %2974 = vmatpush3.xpose.msk.msra.mxu1 %vm784_vm2, %v739_v25  ;;  %2979 = vmatpush3.xpose.msk.msra.mxu0 %vm784_vm2, %v768_v23  ;;  %v2525_v25 = vld [vmem:[%s3528_s12 + $0x8] sm:$0xff] }
 0x432   :  { %v769_v28 = vpop.trf.xlu1  ;;  %2980 = vmatprep.mubr.msk.f32.mxu0 %vm3138_vm1, %v3137_v30  ;;  %2983 = vmatprep.subr.mxu1 %v3137_v30 }
 0x433   :  { %2988 = vmatprep.subr.mxu0 %v3137_v30 }
 0x434   :  { %2976 = vmatmul.mubr.msk.f32.vlgmr.msra.gmra.mrb[16].mxu1 %vm784_vm2, %v1452_v26  ;;  %2981 = vmatmul.mubr.msk.f32.vlgmr.msra.gmra.mrb[12].mxu0 %vm784_vm2, %v1453_v27  ;;  %v2526_v27 = vld [vmem:[%s3528_s12 + $0x10] sm:$0xff] }
 0x435   :  { %2984 = vmatpush3.xpose.msk.msra.mxu1 %vm784_vm2, %v769_v28  ;;  %2985 = vmatprep.mubr.msk.f32.mxu1 %vm3138_vm1, %v3137_v30  ;;  %v2527_v28 = vld [vmem:[%s3528_s12 + $0x18] sm:$0xff] }
 0x436   :  { %v770_v33 = vpop.trf.xlu1  ;;  %2990 = vmatprep.mubr.msk.f32.mxu0 %vm3138_vm1, %v3137_v30  ;;  %2993 = vmatprep.subr.mxu1 %v3137_v30  ;;  %v3075_v29 = vpack.c.bf16 %v2527_v28, %v2526_v27  ;;  %v2811_v27 = vld [vmem:[%s3534_s16] ss:$0 sm:$0xff] }
 0x437   :  { %2989 = vmatpush3.xpose.msk.msra.mxu0 %vm784_vm2, %v770_v33  ;;  %v2620_v33 = vld [vmem:[%s3529_s14 + $0x10] sm:$0xff] }
 0x438   :  { %2986 = vmatmul.mubr.msk.f32.vlgmr.msra.gmra.mrb[18].mxu1 %vm784_vm2, %v1454_v32  ;;  %3064 = vmatprep.subr.bf16.mxu0 %v3063_v56  ;;  %v2619_v32 = vld [vmem:[%s3529_s14 + $0x8] sm:$0xff] }
 0x439   :  { %2995 = vmatprep.mubr.msk.f32.mxu1 %vm3138_vm1, %v3137_v30 }
 0x43a   :  { %v771_v36 = vpop.trf.xlu1  ;;  %2991 = vmatmul.mubr.msk.f32.vlgmr.msra.gmra.mrb[14].mxu0 %vm784_vm2, %v1455_v34  ;;  %v3079_v34 = vpack.c.bf16 %v2619_v32, %v2618_v31  ;;  %v2812_v31 = vld [vmem:[%s3535_s17] ss:$0 sm:$0xff] }
 0x43b   :  { %2994 = vmatpush3.xpose.msk.msra.mxu1 %vm784_vm2, %v771_v36  ;;  %3066 = vmatpush3.bf16.msra.mxu0 %v3063_v56  ;;  %v3083_v36 = vpack.c.bf16 %v2621_v35, %v2620_v33  ;;  %v2625_v56 = vld [vmem:[%s3529_s14 + $0x38] sm:$0xff] }
 0x43c   :  { %3068 = vmatprep.subr.bf16.mxu0 %v3067_v58  ;;  %v3091_v57 = vpack.c.bf16 %v2625_v56, %v2624_v55 }
 0x43e   :  { %2996 = vmatmul.mubr.msk.f32.vlgmr.msra.gmra.mrb[20].mxu1 %vm784_vm2, %v1456_v37  ;;  %v2622_v37 = vld [vmem:[%s3529_s14 + $0x20] sm:$0xff] }
 0x43f   :  { %3070 = vmatpush3.bf16.msra.mxu0 %v3067_v58  ;;  %v2805_v58 = vld [vmem:[%s3532_s13] ss:$0 sm:$0xff] }
 0x440   :  { %3080 = vmatprep.subr.bf16.mxu0 %v3079_v34 }
 0x4fb   :  { %v1529_v38 = vpop.f32.mrb[8].mxu0 }
 0x4fc   :  { %2065 = vxpose.xlu0.b32.start.end [1/1] (short) (narrow) %v1529_v38, 8  ;;  %v2962_v39 = vpop.f32.mrb[9].mxu0  ;;  %v2623_v38 = vld [vmem:[%s3529_s14 + $0x28] sm:$0xff] }
 0x4fd   :  { %v3087_v39 = vpack.c.bf16 %v2623_v38, %v2622_v37 }
 0x4ff   :  { %v1605_v40 = vpop.f32.mrb[14].mxu1 }
 0x500   :  { %2097 = vxpose.xlu0.b32.start.end [1/1] (short) (narrow) %v1605_v40, 8  ;;  %v2967_v41 = vpop.f32.mrb[15].mxu1 }
 0x503   :  { %v1681_v42 = vpop.f32.mrb[10].mxu0 }
 0x504   :  { %2129 = vxpose.xlu0.b32.start.end [1/1] (short) (narrow) %v1681_v42, 8  ;;  %v2972_v43 = vpop.f32.mrb[11].mxu0 }
 0x507   :  { %v1757_v44 = vpop.f32.mrb[16].mxu1  ;;  %v1833_v30 = vpop.f32.mrb[12].mxu0 }
 0x508   :  { %2193 = vxpose.xlu1.b32.start.end [1/1] (short) (narrow) %v1833_v30, 8  ;;  %v2977_v45 = vpop.f32.mrb[17].mxu1  ;;  %v2982_v46 = vpop.f32.mrb[13].mxu0 }
 0x509   :  { %v2803_v46 = vld [vmem:[%s3530_s10] ss:$0 sm:$0xff] }
 0x50b   :  { %v1909_v47 = vpop.f32.mrb[18].mxu1 }
 0x50c   :  { %2225 = vxpose.xlu0.b32.start.end [1/1] (short) (narrow) %v1909_v47, 8  ;;  %v2987_v48 = vpop.f32.mrb[19].mxu1 }
 0x50d   :  { %v1985_v49 = vpop.f32.mrb[14].mxu0  ;;  %v2804_v48 = vld [vmem:[%s3531_s11] ss:$0 sm:$0xff] }
 0x50e   :  { %2257 = vxpose.xlu1.b32.start.end [1/1] (short) (narrow) %v1985_v49, 8  ;;  %v2992_v50 = vpop.f32.mrb[15].mxu0 }
 0x510   :  { %2161 = vxpose.xlu0.b32.start.end [1/1] (short) (narrow) %v1757_v44, 8 }
 0x511   :  { %v2061_v51 = vpop.f32.mrb[20].mxu1 }
 0x512   :  { %2289 = vxpose.xlu1.b32.start.end [1/1] (short) (narrow) %v2061_v51, 8  ;;  %v2997_v52 = vpop.f32.mrb[21].mxu1 }
 0x57c   :  { %v2081_v61 = vpop.trf.xlu0 }
 0x57d   :  { %2321 = vxpose.xlu0.b32.start [1/4] (short) (narrow) %v2081_v61, 8 }
 0x580   :  { %v2113_v62 = vpop.trf.xlu0 }
 0x581   :  { %2322 = vxpose.xlu0.b32.cont [2/4] (short) (narrow) %v2113_v62, 8 }
 0x584   :  { %v2145_v63 = vpop.trf.xlu0 }
 0x585   :  { %2323 = vxpose.xlu0.b32.cont [3/4] (short) (narrow) %v2145_v63, 8 }
 0x588   :  { %v2209_v0 = vpop.trf.xlu1 }
 0x589   :  { %2353 = vxpose.xlu1.b32.start [1/4] (short) (narrow) %v2209_v0, 8 }
 0x58c   :  { %v2241_v1 = vpop.trf.xlu0 }
 0x58d   :  { %2354 = vxpose.xlu1.b32.cont [2/4] (short) (narrow) %v2241_v1, 8 }
 0x58e   :  { %v2273_v2 = vpop.trf.xlu1 }
 0x590   :  { %v2177_v3 = vpop.trf.xlu0 }
 0x591   :  { %2355 = vxpose.xlu1.b32.cont [3/4] (short) (narrow) %v2273_v2, 8  ;;  %2324 = vxpose.xlu0.b32.end [4/4] (short) (narrow) %v2177_v3, 8  ;;  %v2808_v3 = vld [vmem:[%s3533_s15] ss:$0 sm:$0xff] }
 0x592   :  { %v2305_v4 = vpop.trf.xlu1 }
 0x595   :  { %2356 = vxpose.xlu1.b32.end [4/4] (short) (narrow) %v2305_v4, 8 }
 0x605   :  { %v2337_v6 = vpop.trf.xlu0 }
 0x606   :  { %3006 = vmatprep.mubr.msk.f32.mxu0 %vm76_vm0, %v2337_v6 }
 0x609   :  { %v2369_v7 = vpop.trf.xlu1 }
 0x60a   :  { %3007 = vmatmul.mubr.msk.f32.vlgmr.msra.gmra.mrb[16].mxu0 %vm76_vm0, %v2369_v7 }
 0x60b   :  { %3082 = vmatpush3.bf16.msra.mxu0 %v3079_v34 }
 0x60c   :  { %3084 = vmatprep.subr.bf16.mxu0 %v3083_v36 }
 0x60f   :  { %3086 = vmatpush3.bf16.msra.mxu0 %v3083_v36 }
 0x610   :  { %3088 = vmatprep.subr.bf16.mxu0 %v3087_v39 }
 0x613   :  { %3090 = vmatpush3.bf16.msra.mxu0 %v3087_v39 }
 0x614   :  { %3092 = vmatprep.subr.bf16.mxu0 %v3091_v57 }
 0x617   :  { %3094 = vmatpush3.bf16.msra.mxu0 %v3091_v57 }
 0x6dd   :  { %v3008_v9 = vpop.f32.mrb[16].mxu0 }
 0x6de   :  { %v2474_v10 = vadd.f32 %v3008_v9, %v2800_v8  ;;  %v2468_v12 = vpop.f32.mrb[17].mxu0 }
 0x6df   :  { %v2469_v13 = vadd.f32 %v2800_v8, %v2468_v12 }
 0x6e0   :  { %v2478_v14 = vadd.f32 %v2474_v10, %v3266_v11 }
 0x6e1   :  { %v2477_v60 = vadd.f32 %v2469_v13, %v3249_v5  ;;  %v2524_v5 = vld [vmem:[%s3528_s12] sm:$0xff] }
 0x6e2   :  { %v2482_v15 = vsel %vm76_vm0, %v2478_v14, 0.0  ;;  %v3071_v26 = vpack.c.bf16 %v2525_v25, %v2524_v5 }
 0x6e3   :  { %2483 = vadd.xlane.f32.xlu1 %v2482_v15  ;;  %v2479_v59 = vsel %vm76_vm0, %v2477_v60, 0.0 }
 0x6e4   :  { %2480 = vadd.xlane.f32.xlu0 %v2479_v59  ;;  %3072 = vmatprep.subr.bf16.mxu1 %v3071_v26 }
 0x6e5   :  { %3074 = vmatpush3.bf16.msra.mxu1 %v3071_v26 }
 0x6e6   :  { %3076 = vmatprep.subr.bf16.mxu1 %v3075_v29 }
 0x6e9   :  { %3078 = vmatpush3.bf16.msra.mxu1 %v3075_v29 }
 0x770   :  { %v2484_v16 = vpop.xlane.xlu1 %2483 }
 0x771   :  { %v2487_v17 = vmul.f32 0.03125, %v2484_v16  ;;  %v2481_v18 = vpop.xlane.xlu0 %2480 }
 0x772   :  { %v2486_v19 = vmul.f32 0.03125, %v2481_v18 }
 0x773   :  { %v2489_v20 = vsub.f32 %v2478_v14, %v2487_v17 }
 0x774   :  { %v2488_v21 = vsub.f32 %v2477_v60, %v2486_v19 }
 0x775   :  { %v2491_v24 = vmul.f32 %v2489_v20, %v2489_v20 }
 0x776   :  { %v2490_v22 = vmul.f32 %v2488_v21, %v2488_v21 }
 0x777   :  { %v2495_v11 = vsel %vm76_vm0, %v2491_v24, 0.0 }
 0x778   :  { %v2492_v23 = vsel %vm76_vm0, %v2490_v22, 0.0 }
 0x779   :  { %2493 = vadd.xlane.f32.xlu1 %v2492_v23 }
 0x77d   :  { %2496 = vadd.xlane.f32.xlu1 %v2495_v11 }
 0x806   :  { %v2494_v40 = vpop.xlane.xlu1 %2493 }
 0x807   :  { %v2498_v41 = vmul.f32 0.03125, %v2494_v40 }
 0x809   :  { %v2500_v42 = vadd.f32 1e-05, %v2498_v41 }
 0x80a   :  { %v2497_v43 = vpop.xlane.xlu1 %2496 }
 0x80b   :  { %3129 = vrsqrt.f32 %v2500_v42  ;;  %v2499_v44 = vmul.f32 0.03125, %v2497_v43 }
 0x80d   :  { %v2501_v30 = vadd.f32 1e-05, %v2499_v44 }
 0x80f   :  { %3131 = vrsqrt.f32 %v2501_v30 }
 0x815   :  { %v3130_v45 = vpop.eup %3129 }
 0x816   :  { %v2504_v47 = vmul.f32 %v3130_v45, %v2488_v21 }
 0x818   :  { %v2513_v49 = vmul.f32 %v2803_v46, %v2504_v47 }
 0x819   :  { %v3132_v50 = vpop.eup %3131 }
 0x81a   :  { %v2505_v51 = vmul.f32 %v3132_v50, %v2489_v20  ;;  %v2522_v52 = vadd.f32 %v2804_v48, %v2513_v49 }
 0x81c   :  { %v2514_v53 = vmul.f32 %v2803_v46, %v2505_v51  ;;  %3017 = vmatprep.mubr.msk.f32.mxu1 %vm76_vm0, %v2522_v52 }
 0x81e   :  { %v2523_v54 = vadd.f32 %v2804_v48, %v2514_v53 }
 0x820   :  { %3018 = vmatmul.mubr.msk.f32.vlgmr.msra.gmra.mrb[22].mxu1 %vm76_vm0, %v2523_v54 }
 0x8f3   :  { %v3019_v61 = vpop.f32.mrb[22].mxu1 }
 0x8f4   :  { %v2613_v62 = vadd.f32 %v3019_v61, %v2805_v58  ;;  %v2607_v63 = vpop.f32.mrb[23].mxu1 }
 0x8f5   :  { %v2608_v0 = vadd.f32 %v2805_v58, %v2607_v63 }
 0x8f6   :  { %v2617_v2 = vmax.f32 %v2613_v62, 0.0 }
 0x8f7   :  { %v2616_v1 = vmax.f32 %v2608_v0, 0.0 }
 0x8f9   :  { %3036 = vmatprep.mubr.msk.f32.mxu0 %vm2633_vm3, %v2616_v1 }
 0x8fa   :  { %3037 = vmatmul.mubr.msk.f32.vlgmr.msra.gmra.mrb[18].mxu0 %vm2633_vm3, %v2617_v2 }
 0x9cd   :  { %v3038_v4 = vpop.f32.mrb[18].mxu0 }
 0x9ce   :  { %v2712_v6 = vadd.f32 %v3038_v4, %v2808_v3  ;;  %v2706_v7 = vpop.f32.mrb[19].mxu0 }
 0x9cf   :  { %v2707_v8 = vadd.f32 %v2808_v3, %v2706_v7 }
 0x9d0   :  { %v2716_v9 = vadd.f32 %v2712_v6, %v2523_v54 }
 0x9d1   :  { %v2715_v10 = vadd.f32 %v2707_v8, %v2522_v52 }
 0x9d2   :  { %v2720_v12 = vsel %vm76_vm0, %v2716_v9, 0.0 }
 0x9d3   :  { %2721 = vadd.xlane.f32.xlu1 %v2720_v12  ;;  %v2717_v13 = vsel %vm76_vm0, %v2715_v10, 0.0 }
 0x9d4   :  { %2718 = vadd.xlane.f32.xlu0 %v2717_v13 }
 0xa60   :  { %v2722_v14 = vpop.xlane.xlu1 %2721 }
 0xa61   :  { %v2724_v60 = vmul.f32 0.03125, %v2722_v14  ;;  %v2719_v15 = vpop.xlane.xlu0 %2718 }
 0xa62   :  { %v2723_v59 = vmul.f32 0.03125, %v2719_v15 }
 0xa63   :  { %v2726_v16 = vsub.f32 %v2716_v9, %v2724_v60 }
 0xa64   :  { %v2725_v17 = vsub.f32 %v2715_v10, %v2723_v59 }
 0xa65   :  { %v2728_v18 = vmul.f32 %v2726_v16, %v2726_v16 }
 0xa66   :  { %v2727_v19 = vmul.f32 %v2725_v17, %v2725_v17 }
 0xa67   :  { %v2732_v20 = vsel %vm76_vm0, %v2728_v18, 0.0 }
 0xa68   :  { %2733 = vadd.xlane.f32.xlu1 %v2732_v20  ;;  %v2729_v21 = vsel %vm76_vm0, %v2727_v19, 0.0 }
 0xa69   :  { %2730 = vadd.xlane.f32.xlu0 %v2729_v21 }
 0xaf5   :  { %v2734_v22 = vpop.xlane.xlu1 %2733 }
 0xaf6   :  { %v2736_v23 = vmul.f32 0.03125, %v2734_v22  ;;  %v2731_v24 = vpop.xlane.xlu0 %2730 }
 0xaf7   :  { %v2735_v11 = vmul.f32 0.03125, %v2731_v24 }
 0xaf8   :  { %v2738_v5 = vadd.f32 1e-05, %v2736_v23 }
 0xaf9   :  { %v2737_v25 = vadd.f32 1e-05, %v2735_v11 }
 0xafa   :  { %3133 = vrsqrt.f32 %v2738_v5 }
 0xafb   :  { %3135 = vrsqrt.f32 %v2737_v25 }
 0xb04   :  { %v3134_v26 = vpop.eup %3133 }
 0xb05   :  { %v3136_v28 = vpop.eup %3135  ;;  %v2742_v29 = vmul.f32 %v3134_v26, %v2726_v16 }
 0xb06   :  { %v2741_v32 = vmul.f32 %v3136_v28, %v2725_v17 }
 0xb07   :  { %v2751_v33 = vmul.f32 %v2811_v27, %v2742_v29 }
 0xb08   :  { %v2750_v34 = vmul.f32 %v2811_v27, %v2741_v32 }
 0xb09   :  { %v2760_v35 = vadd.f32 %v2812_v31, %v2751_v33 }
 0xb0a   :  { %v2759_v36 = vadd.f32 %v2812_v31, %v2750_v34 }
 0xb0b   :  { %2762 = vst.msk [vmem:[%s3536_s18 + $0x8] sm:$0xff] %vm76_vm0, %v2760_v35 }
 0xb0c   :  { %2761 = vst.msk [vmem:[%s3536_s18] sm:$0xff] %vm76_vm0, %v2759_v36 }

</bundles_post_ra>
